<compile_context>
chip_gen: v7x
topology: tpu7x:2x2x1
jax: 0.10.0
libtpu: 0.0.40
codegen_flags: <defaults>
</compile_context>

<pallas_src>
import jax
import jax.numpy as jnp
from jax.experimental import pallas as pl
from jax.experimental.pallas import tpu as pltpu


def _bn_fold(gamma, beta, running_mean, running_var, eps=1e-5):
    """Fold BatchNorm1d (eval mode) into y = x*scale + shift (1-D vectors)."""
    inv = gamma / jnp.sqrt(running_var + eps)
    scale = inv
    shift = beta - running_mean * inv
    return scale.astype(jnp.float32), shift.astype(jnp.float32)


def siamese_kernel(x_ref, y_ref, w1t_ref, w2t_ref, p_ref, out_ref):
    # x_ref, y_ref : (10, TB)  feature-major batch tiles (batch on lanes)
    # w1t_ref      : (32, 10)  Linear(10,32) weight, transposed
    # w2t_ref      : (8, 32)   Linear(32,8)  weight, transposed
    # p_ref        : (32, 8)   packed per-layer vectors (see wrapper)
    # out_ref      : (1, TB)
    tb = x_ref.shape[-1]

    p = p_ref[...]
    b1c = p[:, 0:1]          # (32,1) Linear(10,32) bias
    s1c = p[:, 1:2]          # (32,1) folded BN(32) scale
    t1c = p[:, 2:3]          # (32,1) folded BN(32) shift
    b2c = p[:8, 3:4]         # (8,1)  Linear(32,8) bias
    w3c = p[:8, 4:5]         # (8,1)  BN(8)-folded Linear(8,1) weight
    b3f = p[0:1, 5:6]        # (1,1)  BN(8)-folded Linear(8,1) bias
    s3 = p[1:2, 5:6]         # (1,1)  folded BN(1) scale
    t3 = p[2:3, 5:6]         # (1,1)  folded BN(1) shift

    # --- shared branch: both twins through ONE matmul (32,10) @ (10, 2*TB) ---
    xy = jnp.concatenate([x_ref[...], y_ref[...]], axis=1)                # (10, 2*TB)
    h1 = jnp.dot(w1t_ref[...], xy, preferred_element_type=jnp.float32) + b1c
    h1 = jnp.maximum(h1, 0.0)                                             # ReLU
    h1 = h1 * s1c + t1c                                                   # BN(32) eval; Dropout = id
    z = h1[:, :tb] * h1[:, tb:]                                           # fx * fy, (32, TB)

    # --- classification head ---
    h2 = jnp.dot(w2t_ref[...], z, preferred_element_type=jnp.float32) + b2c
    h2 = jnp.maximum(h2, 0.0)                                             # ReLU; BN(8) folded into w3c/b3f
    # Linear(8,1) as VPU broadcast-mul + 8-sublane reduce
    h3 = jnp.sum(h2 * w3c, axis=0, keepdims=True) + b3f                   # (1, TB)
    h3 = jnp.maximum(h3, 0.0)                                             # ReLU
    out_ref[...] = (h3 * s3 + t3).astype(out_ref.dtype)                   # BN(1) eval


def siamese_forward(x, y, params, *, batch_tile=256):
    """x, y: any shape (B, ...) that flattens to (B, 10). Returns (B, 1)."""
    B = x.shape[0]
    x2 = x.reshape(B, -1).astype(jnp.float32)   # flatten(start_dim=1)
    y2 = y.reshape(B, -1).astype(jnp.float32)
    assert x2.shape[1] == 10 and y2.shape[1] == 10

    (w1, b1, g1, be1, rm1, rv1,
     w2, b2, g2, be2, rm2, rv2,
     w3, b3, g3, be3, rm3, rv3) = params

    s1, t1 = _bn_fold(g1, be1, rm1, rv1)        # (32,)
    s2, t2 = _bn_fold(g2, be2, rm2, rv2)        # (8,)
    s3, t3 = _bn_fold(g3, be3, rm3, rv3)        # (1,)

    # Fold BN(8) into Linear(8,1):  (r*s2+t2) @ w3 + b3 == r @ (s2*w3) + (t2@w3 + b3)
    w3f = s2 * w3[:, 0]                         # (8,)
    b3f = jnp.dot(t2, w3[:, 0]) + b3[0]         # scalar

    # Pack all small per-layer vectors into one (32, 8) f32 slab.
    pcol = jnp.zeros((32, 8), jnp.float32)
    pcol = pcol.at[:, 0].set(b1)
    pcol = pcol.at[:, 1].set(s1)
    pcol = pcol.at[:, 2].set(t1)
    pcol = pcol.at[:8, 3].set(b2)
    pcol = pcol.at[:8, 4].set(w3f)
    pcol = pcol.at[0, 5].set(b3f)
    pcol = pcol.at[1, 5].set(s3[0])
    pcol = pcol.at[2, 5].set(t3[0])

    w1t = w1.T.astype(jnp.float32)              # (32, 10)
    w2t = w2.T.astype(jnp.float32)              # (8, 32)

    # Feature-major inputs: batch on the lane axis, padded to the lane tile.
    tb = batch_tile
    Bp = -(-B // tb) * tb
    xt = jnp.zeros((10, Bp), jnp.float32).at[:, :B].set(x2.T)
    yt = jnp.zeros((10, Bp), jnp.float32).at[:, :B].set(y2.T)

    out = pl.pallas_call(
        siamese_kernel,
        out_shape=jax.ShapeDtypeStruct((1, Bp), jnp.float32),
        grid=(Bp // tb,),
        in_specs=[
            pl.BlockSpec((10, tb), lambda i: (0, i)),   # x tile
            pl.BlockSpec((10, tb), lambda i: (0, i)),   # y tile
            pl.BlockSpec((32, 10), lambda i: (0, 0)),   # w1^T (resident)
            pl.BlockSpec((8, 32), lambda i: (0, 0)),    # w2^T (resident)
            pl.BlockSpec((32, 8), lambda i: (0, 0)),    # packed param slab
        ],
        out_specs=pl.BlockSpec((1, tb), lambda i: (0, i)),
        compiler_params=pltpu.CompilerParams(
            dimension_semantics=("parallel",)),
    )(xt, yt, w1t, w2t, pcol)

    return out[0, :B][:, None]                  # (B, 1) — matches nn.Module output


def init_params(key):
    ks = jax.random.split(key, 6)

    def linear(kw, fan_in, fan_out):
        lim = 1.0 / jnp.sqrt(fan_in)
        kw1, kw2 = jax.random.split(kw)
        w = jax.random.uniform(kw1, (fan_in, fan_out), jnp.float32, -lim, lim)
        b = jax.random.uniform(kw2, (fan_out,), jnp.float32, -lim, lim)
        return w, b

    def bn(kb, n):
        k1, k2, k3 = jax.random.split(kb, 3)
        gamma = 1.0 + 0.1 * jax.random.normal(k1, (n,), jnp.float32)
        beta = 0.1 * jax.random.normal(k2, (n,), jnp.float32)
        rmean = 0.05 * jax.random.normal(k3, (n,), jnp.float32)
        rvar = jnp.ones((n,), jnp.float32)
        return gamma, beta, rmean, rvar

    w1, b1 = linear(ks[0], 10, 32)
    g1, be1, rm1, rv1 = bn(ks[1], 32)
    w2, b2 = linear(ks[2], 32, 8)
    g2, be2, rm2, rv2 = bn(ks[3], 8)
    w3, b3 = linear(ks[4], 8, 1)
    g3, be3, rm3, rv3 = bn(ks[5], 1)
    return (w1, b1, g1, be1, rm1, rv1,
            w2, b2, g2, be2, rm2, rv2,
            w3, b3, g3, be3, rm3, rv3)


def reference_forward(x, y, params):
    """Pure-JAX reference (same eval-mode semantics) for a sanity check."""
    B = x.shape[0]
    x2 = x.reshape(B, -1)
    y2 = y.reshape(B, -1)
    (w1, b1, g1, be1, rm1, rv1,
     w2, b2, g2, be2, rm2, rv2,
     w3, b3, g3, be3, rm3, rv3) = params
    s1, t1 = _bn_fold(g1, be1, rm1, rv1)
    s2, t2 = _bn_fold(g2, be2, rm2, rv2)
    s3, t3 = _bn_fold(g3, be3, rm3, rv3)

    def shared(inp):
        h = jnp.maximum(inp @ w1 + b1, 0.0)
        return h * s1 + t1

    z = shared(x2) * shared(y2)
    h = jnp.maximum(z @ w2 + b2, 0.0) * s2 + t2
    h = jnp.maximum(h @ w3 + b3, 0.0) * s3 + t3
    return h


if __name__ == "__main__":
    key = jax.random.PRNGKey(0)
    kp, kx, ky = jax.random.split(key, 3)
    params = init_params(kp)

    # Inputs: (batch=8, 2, 5) → flatten(start_dim=1) → (8, 10)
    x = jax.random.normal(kx, (8, 2, 5), jnp.float32)
    y = jax.random.normal(ky, (8, 2, 5), jnp.float32)

    out = jax.block_until_ready(siamese_forward(x, y, params))
    ref = reference_forward(x, y, params)
    assert out.shape == (8, 1)
    assert jnp.allclose(out, ref, atol=2e-5, rtol=2e-5), (out, ref)
    print("KERNEL_OK")
</pallas_src>

<mosaic_0001>
module attributes {stable_mosaic.version = 11 : i64} {
  func.func @siamese_kernel(%arg0: i32, %arg1: memref<10x256xf32, #tpu.memory_space<vmem>>, %arg2: memref<10x256xf32, #tpu.memory_space<vmem>>, %arg3: memref<32x10xf32, #tpu.memory_space<vmem>>, %arg4: memref<8x32xf32, #tpu.memory_space<vmem>>, %arg5: memref<32x8xf32, #tpu.memory_space<vmem>>, %arg6: memref<1x256xf32, #tpu.memory_space<vmem>>) attributes {dimension_semantics = [#tpu.dimension_semantics<parallel>], iteration_bounds = array<i64: 1>, scalar_prefetch = 0 : i64, scratch_operands = 0 : i64, tpu.core_type = #tpu.core_type<tc>, window_params = [{transform_indices = @transform_0, window_bounds = array<i64: 10, 256>}, {transform_indices = @transform_1, window_bounds = array<i64: 10, 256>}, {pipeline_mode = #tpu.pipeline_mode<synchronous>, transform_indices = @transform_2, window_bounds = array<i64: 32, 10>}, {pipeline_mode = #tpu.pipeline_mode<synchronous>, transform_indices = @transform_3, window_bounds = array<i64: 8, 32>}, {pipeline_mode = #tpu.pipeline_mode<synchronous>, transform_indices = @transform_4, window_bounds = array<i64: 32, 8>}, {transform_indices = @transform_5, window_bounds = array<i64: 1, 256>}]} {
    %c0 = arith.constant 0 : index
    %c0_0 = arith.constant 0 : index
    %0 = vector.load %arg5[%c0, %c0_0] : memref<32x8xf32, #tpu.memory_space<vmem>>, vector<32x8xf32>
    %1 = vector.extract_strided_slice %0 {offsets = [0, 0], sizes = [32, 1], strides = [1, 1]} : vector<32x8xf32> to vector<32x1xf32>
    %2 = vector.extract_strided_slice %0 {offsets = [0, 1], sizes = [32, 1], strides = [1, 1]} : vector<32x8xf32> to vector<32x1xf32>
    %3 = vector.extract_strided_slice %0 {offsets = [0, 2], sizes = [32, 1], strides = [1, 1]} : vector<32x8xf32> to vector<32x1xf32>
    %4 = vector.extract_strided_slice %0 {offsets = [0, 3], sizes = [8, 1], strides = [1, 1]} : vector<32x8xf32> to vector<8x1xf32>
    %5 = vector.extract_strided_slice %0 {offsets = [0, 4], sizes = [8, 1], strides = [1, 1]} : vector<32x8xf32> to vector<8x1xf32>
    %6 = vector.extract_strided_slice %0 {offsets = [0, 5], sizes = [1, 1], strides = [1, 1]} : vector<32x8xf32> to vector<1x1xf32>
    %7 = vector.extract_strided_slice %0 {offsets = [1, 5], sizes = [1, 1], strides = [1, 1]} : vector<32x8xf32> to vector<1x1xf32>
    %8 = vector.extract_strided_slice %0 {offsets = [2, 5], sizes = [1, 1], strides = [1, 1]} : vector<32x8xf32> to vector<1x1xf32>
    %c0_1 = arith.constant 0 : index
    %c0_2 = arith.constant 0 : index
    %9 = vector.load %arg1[%c0_1, %c0_2] : memref<10x256xf32, #tpu.memory_space<vmem>>, vector<10x256xf32>
    %c0_3 = arith.constant 0 : index
    %c0_4 = arith.constant 0 : index
    %10 = vector.load %arg2[%c0_3, %c0_4] : memref<10x256xf32, #tpu.memory_space<vmem>>, vector<10x256xf32>
    %11 = tpu.concatenate %9, %10 in 1 : vector<10x256xf32>, vector<10x256xf32> -> vector<10x512xf32>
    %c0_5 = arith.constant 0 : index
    %c0_6 = arith.constant 0 : index
    %12 = vector.load %arg3[%c0_5, %c0_6] : memref<32x10xf32, #tpu.memory_space<vmem>>, vector<32x10xf32>
    %cst = arith.constant dense<0.000000e+00> : vector<32x512xf32>
    %13 = tpu.matmul %12, %11, %cst {dimension_numbers = #tpu.dot_dimension_numbers<[1], [0], [0], [1], [0, 0, 1, 1], [], []>} : vector<32x10xf32>, vector<10x512xf32>, vector<32x512xf32> -> vector<32x512xf32>
    %14 = vector.broadcast %1 : vector<32x1xf32> to vector<32x512xf32>
    %15 = arith.addf %13, %14 : vector<32x512xf32>
    %cst_7 = arith.constant 0.000000e+00 : f32
    %16 = vector.broadcast %cst_7 : f32 to vector<32x512xf32>
    %17 = arith.maximumf %15, %16 : vector<32x512xf32>
    %18 = vector.broadcast %2 : vector<32x1xf32> to vector<32x512xf32>
    %19 = arith.mulf %17, %18 : vector<32x512xf32>
    %20 = vector.broadcast %3 : vector<32x1xf32> to vector<32x512xf32>
    %21 = arith.addf %19, %20 : vector<32x512xf32>
    %22 = vector.extract_strided_slice %21 {offsets = [0, 0], sizes = [32, 256], strides = [1, 1]} : vector<32x512xf32> to vector<32x256xf32>
    %23 = vector.extract_strided_slice %21 {offsets = [0, 256], sizes = [32, 256], strides = [1, 1]} : vector<32x512xf32> to vector<32x256xf32>
    %24 = arith.mulf %22, %23 : vector<32x256xf32>
    %c0_8 = arith.constant 0 : index
    %c0_9 = arith.constant 0 : index
    %25 = vector.load %arg4[%c0_8, %c0_9] : memref<8x32xf32, #tpu.memory_space<vmem>>, vector<8x32xf32>
    %cst_10 = arith.constant dense<0.000000e+00> : vector<8x256xf32>
    %26 = tpu.matmul %25, %24, %cst_10 {dimension_numbers = #tpu.dot_dimension_numbers<[1], [0], [0], [1], [0, 0, 1, 1], [], []>} : vector<8x32xf32>, vector<32x256xf32>, vector<8x256xf32> -> vector<8x256xf32>
    %27 = vector.broadcast %4 : vector<8x1xf32> to vector<8x256xf32>
    %28 = arith.addf %26, %27 : vector<8x256xf32>
    %cst_11 = arith.constant 0.000000e+00 : f32
    %29 = vector.broadcast %cst_11 : f32 to vector<8x256xf32>
    %30 = arith.maximumf %28, %29 : vector<8x256xf32>
    %31 = vector.broadcast %5 : vector<8x1xf32> to vector<8x256xf32>
    %32 = arith.mulf %30, %31 : vector<8x256xf32>
    %cst_12 = arith.constant dense<0.000000e+00> : vector<256xf32>
    %33 = vector.multi_reduction <add>, %32, %cst_12 [0] : vector<8x256xf32> to vector<256xf32>
    %34 = vector.shape_cast %33 : vector<256xf32> to vector<1x256xf32>
    %35 = vector.broadcast %6 : vector<1x1xf32> to vector<1x256xf32>
    %36 = arith.addf %34, %35 : vector<1x256xf32>
    %cst_13 = arith.constant 0.000000e+00 : f32
    %37 = vector.broadcast %cst_13 : f32 to vector<1x256xf32>
    %38 = arith.maximumf %36, %37 : vector<1x256xf32>
    %39 = vector.broadcast %7 : vector<1x1xf32> to vector<1x256xf32>
    %40 = arith.mulf %38, %39 : vector<1x256xf32>
    %41 = vector.broadcast %8 : vector<1x1xf32> to vector<1x256xf32>
    %42 = arith.addf %40, %41 : vector<1x256xf32>
    %c0_14 = arith.constant 0 : index
    %c0_15 = arith.constant 0 : index
    %43 = vector.load %arg6[%c0_14, %c0_15] : memref<1x256xf32, #tpu.memory_space<vmem>>, vector<1x256xf32>
    tpu.vector_store %arg6[%c0_14, %c0_15], %42 {strides = array<i32>} : memref<1x256xf32, #tpu.memory_space<vmem>>, vector<1x256xf32>,
    return
  }
  func.func @transform_0(%arg0: i32) -> (i32, i32) {
    %c0_i32 = arith.constant 0 : i32
    %c0_i32_0 = arith.constant 0 : i32
    return %c0_i32, %arg0 : i32, i32
  }
  func.func @transform_1(%arg0: i32) -> (i32, i32) {
    %c0_i32 = arith.constant 0 : i32
    %c0_i32_0 = arith.constant 0 : i32
    return %c0_i32, %arg0 : i32, i32
  }
  func.func @transform_2(%arg0: i32) -> (i32, i32) {
    %c0_i32 = arith.constant 0 : i32
    %c0_i32_0 = arith.constant 0 : i32
    %c0_i32_1 = arith.constant 0 : i32
    return %c0_i32, %c0_i32_0 : i32, i32
  }
  func.func @transform_3(%arg0: i32) -> (i32, i32) {
    %c0_i32 = arith.constant 0 : i32
    %c0_i32_0 = arith.constant 0 : i32
    %c0_i32_1 = arith.constant 0 : i32
    return %c0_i32, %c0_i32_0 : i32, i32
  }
  func.func @transform_4(%arg0: i32) -> (i32, i32) {
    %c0_i32 = arith.constant 0 : i32
    %c0_i32_0 = arith.constant 0 : i32
    %c0_i32_1 = arith.constant 0 : i32
    return %c0_i32, %c0_i32_0 : i32, i32
  }
  func.func @transform_5(%arg0: i32) -> (i32, i32) {
    %c0_i32 = arith.constant 0 : i32
    %c0_i32_0 = arith.constant 0 : i32
    return %c0_i32, %arg0 : i32, i32
  }
}

</mosaic_0001>

<bundles_post_ra>
// kernel: tpu_custom_call.1
= control target key start
LH: loop header
LB: loop body
LE: loop exit
PB: predicated region body
PF: predicated region fallthrough
CT: control target
= control target key end

     0   :  { %vm70_vm0 = vcmask 1041408   ;;  %vm581_vm1 = vmmov 1   ;;  %v582_v11 = vmov 0.0   ;;  %v583_v14 = vmov 0   ;;  %s710_s0 = inlined_call_operand.vmem [shape: f32[10,256], index: 0, kind: input, shape index: {}]   ;;  %s711_s1 = inlined_call_operand.vmem [shape: f32[10,256], index: 1, kind: input, shape index: {}]   ;;  %s712_s2 = inlined_call_operand.vmem [shape: f32[32,10], index: 2, kind: input, shape index: {}]   ;;  %s713_s3 = inlined_call_operand.vmem [shape: f32[8,32], index: 3, kind: input, shape index: {}]   ;;  %s714_s4 = inlined_call_operand.vmem [shape: f32[32,8], index: 4, kind: input, shape index: {}]   ;;  %s715_s5 = inlined_call_operand.hbm [shape: f32[1,256], index: 5, kind: output, shape index: {}]  }
   0x1   :  { %v26_v0 = vld [vmem:[%s710_s0 + $0x8] sm:$0xff]  ;;  %v28_v1 = vld [vmem:[%s710_s0 + $0x18] sm:$0x3]  ;;  %vm630_vm2 = vmpackc.low %vm70_vm0, %vm581_vm1  ;;  %147 = vmatprep.mubr.f32.mxu0 %v582_v11  ;;  %236 = vmatprep.mubr.f32.mxu1 %v582_v11  ;;  %vm57_vm3 = vcmask 80896  }
   0x2   :  { %v30_v2 = vld [vmem:[%s711_s1 + $0x8] sm:$0xff]  ;;  %v515_v3 = vpack.c.bf16 %v28_v1, %v26_v0  ;;  %v32_v5 = vld [vmem:[%s711_s1 + $0x18] sm:$0x3]  ;;  %v25_v6 = vld [vmem:[%s710_s0] sm:$0xff]  ;;  %546 = vset.pattern.permute.xlu1 %v583_v14  ;;  %545 = vset.pattern.permute.xlu0 %v583_v14 }
   0x3   :  { %v521_v7 = vpack.c.bf16 %v32_v5, %v30_v2  ;;  %v27_v8 = vld [vmem:[%s710_s0 + $0x10] sm:$0x3]  ;;  %v29_v9 = vld [vmem:[%s711_s1] sm:$0xff] }
   0x4   :  { %v31_v10 = vld [vmem:[%s711_s1 + $0x10] sm:$0x3]  ;;  %517 = vmatprep.subr.msk.bf16.mxu0 %vm630_vm2, %v515_v3  ;;  %v518_v12 = vpack.c.bf16 %v27_v8, %v25_v6  ;;  %v33_v16 = vld [vmem:[%s712_s2] sm:$0xff] }
   0x5   :  { %v524_v13 = vpack.c.bf16 %v31_v10, %v29_v9  ;;  %523 = vmatprep.subr.msk.bf16.mxu1 %vm630_vm2, %v521_v7  ;;  %v23_v15 = vld [vmem:[%s714_s4 + $0x10] sm:$0xff]  ;;  %v21_v17 = vld [vmem:[%s714_s4] sm:$0xff] }
   0x6   :  { %520 = vmatpush1.bf16.msk.msra.mxu0 %vm630_vm2, %v518_v12 }
   0x7   :  { %526 = vmatpush1.bf16.msk.msra.mxu1 %vm630_vm2, %v524_v13 }
   0x8   :  { %10 = vsyncpa [#allocation3], 0  ;;  %49 = vperm.xlu1 %546, %v23_v15   ;;  %39 = vperm.xlu0 %545, %v21_v17   ;;  %v24_v18 = vld [vmem:[%s714_s4 + $0x18] sm:$0xff]  ;;  %v34_v19 = vld [vmem:[%s712_s2 + $0x8] sm:$0xff]  ;;  %v584_v22 = vmov 1   ;;  %v585_v24 = vmov 2  }
   0x9   :  { %504 = vmatmul.mubr.msk.f32.vlgmr.msra.gmra.mrb[0].mxu0 %vm57_vm3, %v33_v16  ;;  %v22_v20 = vld [vmem:[%s714_s4 + $0x8] sm:$0xff]  ;;  %v35_v21 = vld [vmem:[%s712_s2 + $0x10] sm:$0xff]  ;;  %v36_v23 = vld [vmem:[%s712_s2 + $0x18] sm:$0xff]  ;;  %v586_v25 = vmov 3   ;;  %v587_v26 = vmov 4   ;;  %v588_v27 = vmov 5  }
   0xa   :  { %510 = vmatmul.mubr.msk.f32.vlgmr.msra.gmra.mrb[0].mxu1 %vm57_vm3, %v33_v16  ;;  %153 = vmatprep.mubr.f32.mxu0 %v582_v11  ;;  %vm354_vm4 = vcmask 261120  }
   0xb   :  { %242 = vmatprep.mubr.f32.mxu1 %v582_v11 }
   0xc   :  { %54 = vperm.xlu1 %546, %v24_v18   ;;  %44 = vperm.xlu0 %545, %v22_v20  }
   0xd   :  { %505 = vmatmul.mubr.msk.f32.gmra.mrb[2].mxu0 %vm57_vm3, %v34_v19 }
   0xe   :  { %511 = vmatmul.mubr.msk.f32.gmra.mrb[2].mxu1 %vm57_vm3, %v34_v19  ;;  %159 = vmatprep.mubr.f32.mxu0 %v582_v11 }
   0xf   :  { %248 = vmatprep.mubr.f32.mxu1 %v582_v11 }
  0x10   :  { %548 = vset.pattern.permute.xlu1 %v584_v22  ;;  %547 = vset.pattern.permute.xlu0 %v584_v22 }
  0x11   :  { %282 = vperm.xlu1 %548, %v22_v20   ;;  %278 = vperm.xlu0 %547, %v21_v17  }
  0x12   :  { %506 = vmatmul.mubr.msk.f32.gmra.mrb[4].mxu0 %vm57_vm3, %v35_v21  ;;  %512 = vmatmul.mubr.msk.f32.gmra.mrb[4].mxu1 %vm57_vm3, %v35_v21 }
  0x13   :  { %165 = vmatprep.mubr.f32.mxu0 %v582_v11  ;;  %254 = vmatprep.mubr.f32.mxu1 %v582_v11 }
  0x15   :  { %549 = vset.pattern.permute.xlu1 %v585_v24  ;;  %550 = vset.pattern.permute.xlu0 %v585_v24 }
  0x16   :  { %507 = vmatmul.mubr.msk.f32.gmra.mrb[6].mxu0 %vm57_vm3, %v36_v23  ;;  %513 = vmatmul.mubr.msk.f32.gmra.mrb[6].mxu1 %vm57_vm3, %v36_v23 }
  0x17   :  { %310 = vperm.xlu1 %549, %v21_v17   ;;  %314 = vperm.xlu0 %550, %v22_v20  }
  0x18   :  { %422 = vmatprep.mubr.f32.mxu0 %v582_v11 }
  0x1b   :  { %551 = vset.pattern.permute.xlu1 %v584_v22  ;;  %318 = vperm.xlu0 %550, %v23_v15  }
  0x1c   :  { %286 = vperm.xlu1 %551, %v23_v15  }
  0x1f   :  { %553 = vset.pattern.permute.xlu0 %v586_v25 }
  0x20   :  { %290 = vperm.xlu1 %551, %v24_v18   ;;  %351 = vperm.xlu0 %553, %v21_v17  }
  0x24   :  { %552 = vset.pattern.permute.xlu1 %v585_v24  ;;  %556 = vset.pattern.permute.xlu0 %v588_v27 }
  0x25   :  { %322 = vperm.xlu1 %552, %v24_v18  }
  0x29   :  { %554 = vset.pattern.permute.xlu1 %v587_v26 }
  0x2a   :  { %432 = vperm.xlu1 %554, %v21_v17  }
  0x2e   :  { %555 = vset.pattern.permute.xlu1 %v588_v27 }
  0x2f   :  { %450 = vperm.xlu1 %555, %v21_v17  }
  0x87   :  { %v50_v28 = vpop.permute.xlu1 %49  ;;  %v40_v30 = vpop.permute.xlu0 %39 }
  0x8b   :  { %v689_v29 = vpop.permute.xlu1 %54  ;;  %v45_v32 = vpop.permute.xlu0 %44 }
  0x90   :  { %v283_v31 = vpop.permute.xlu1 %282  ;;  %v279_v34 = vpop.permute.xlu0 %278 }
  0x96   :  { %v311_v33 = vpop.permute.xlu1 %310  ;;  %v315_v46 = vpop.permute.xlu0 %314 }
  0x9a   :  { %v319_v22 = vpop.permute.xlu0 %318 }
  0x9b   :  { %v287_v45 = vpop.permute.xlu1 %286 }
  0x9f   :  { %v291_v21 = vpop.permute.xlu1 %290 }
  0xdc   :  { %v149_v35 = vpop.f32.mrb[0].mxu0 }
  0xdd   :  { %v238_v36 = vpop.f32.mrb[0].mxu1  ;;  %v150_v37 = vadd.f32 %v149_v35, %v40_v30  ;;  %v151_v39 = vpop.f32.mrb[1].mxu0 }
  0xde   :  { %v239_v38 = vadd.f32 %v238_v36, %v40_v30  ;;  %v240_v40 = vpop.f32.mrb[1].mxu1  ;;  %v152_v41 = vadd.f32 %v151_v39, %v40_v30 }
  0xdf   :  { %v241_v42 = vadd.f32 %v240_v40, %v40_v30  ;;  %v261_v43 = vmax.f32 %v150_v37, 0.0 }
  0xe0   :  { %v263_v44 = vmax.f32 %v239_v38, 0.0  ;;  %v262_v47 = vmax.f32 %v152_v41, 0.0  ;;  %v155_v49 = vpop.f32.mrb[2].mxu0 }
  0xe1   :  { %v264_v48 = vmax.f32 %v241_v42, 0.0  ;;  %v244_v50 = vpop.f32.mrb[2].mxu1  ;;  %v293_v51 = vmul.f32 %v279_v34, %v261_v43  ;;  %v156_v53 = vadd.f32 %v155_v49, %v45_v32  ;;  %v157_v55 = vpop.f32.mrb[3].mxu0 }
  0xe2   :  { %v295_v52 = vmul.f32 %v279_v34, %v263_v44  ;;  %v245_v54 = vadd.f32 %v244_v50, %v45_v32  ;;  %v246_v56 = vpop.f32.mrb[3].mxu1  ;;  %v294_v57 = vmul.f32 %v279_v34, %v262_v47  ;;  %v158_v59 = vadd.f32 %v157_v55, %v45_v32  ;;  %v323_v49 = vpop.permute.xlu1 %322 }
  0xe3   :  { %v296_v58 = vmul.f32 %v279_v34, %v264_v48  ;;  %v247_v60 = vadd.f32 %v246_v56, %v45_v32  ;;  %v325_v61 = vadd.f32 %v311_v33, %v293_v51  ;;  %v265_v63 = vmax.f32 %v156_v53, 0.0 }
  0xe4   :  { %v327_v62 = vadd.f32 %v311_v33, %v295_v52  ;;  %v267_v0 = vmax.f32 %v245_v54, 0.0  ;;  %v326_v1 = vadd.f32 %v311_v33, %v294_v57  ;;  %v266_v3 = vmax.f32 %v158_v59, 0.0 }
  0xe5   :  { %v328_v2 = vadd.f32 %v311_v33, %v296_v58  ;;  %v268_v4 = vmax.f32 %v247_v60, 0.0  ;;  %v161_v5 = vpop.f32.mrb[4].mxu0  ;;  %v250_v6 = vpop.f32.mrb[4].mxu1  ;;  %v297_v7 = vmul.f32 %v283_v31, %v265_v63 }
  0xe6   :  { %v299_v8 = vmul.f32 %v283_v31, %v267_v0  ;;  %v162_v9 = vadd.f32 %v161_v5, %v50_v28  ;;  %v251_v10 = vadd.f32 %v250_v6, %v50_v28  ;;  %v163_v11 = vpop.f32.mrb[5].mxu0  ;;  %v252_v12 = vpop.f32.mrb[5].mxu1  ;;  %v298_v13 = vmul.f32 %v283_v31, %v266_v3 }
  0xe7   :  { %v300_v14 = vmul.f32 %v283_v31, %v268_v4  ;;  %v164_v15 = vadd.f32 %v163_v11, %v50_v28  ;;  %v253_v16 = vadd.f32 %v252_v12, %v50_v28  ;;  %v329_v17 = vadd.f32 %v315_v46, %v297_v7 }
  0xe8   :  { %v331_v18 = vadd.f32 %v315_v46, %v299_v8  ;;  %v269_v19 = vmax.f32 %v162_v9, 0.0  ;;  %v271_v20 = vmax.f32 %v251_v10, 0.0  ;;  %v330_v23 = vadd.f32 %v315_v46, %v298_v13  ;;  %v433_v10 = vpop.permute.xlu1 %432 }
  0xe9   :  { %v332_v24 = vadd.f32 %v315_v46, %v300_v14  ;;  %v270_v25 = vmax.f32 %v164_v15, 0.0  ;;  %v272_v26 = vmax.f32 %v253_v16, 0.0  ;;  %v167_v27 = vpop.f32.mrb[6].mxu0  ;;  %v256_v30 = vpop.f32.mrb[6].mxu1  ;;  %v342_v53 = vmul.f32 %v328_v2, %v326_v1 }
  0xea   :  { %v343_v32 = vmul.f32 %v331_v18, %v329_v17  ;;  %v301_v33 = vmul.f32 %v287_v45, %v269_v19  ;;  %v303_v34 = vmul.f32 %v287_v45, %v271_v20  ;;  %v168_v35 = vadd.f32 %v167_v27, %v689_v29  ;;  %v169_v31 = vpop.f32.mrb[7].mxu0  ;;  %v258_v36 = vpop.f32.mrb[7].mxu1 }
  0xeb   :  { %v302_v28 = vmul.f32 %v287_v45, %v270_v25  ;;  %v304_v37 = vmul.f32 %v287_v45, %v272_v26  ;;  %v257_v38 = vadd.f32 %v256_v30, %v689_v29  ;;  %v170_v39 = vadd.f32 %v169_v31, %v689_v29 }
  0xec   :  { %v333_v40 = vadd.f32 %v319_v22, %v301_v33  ;;  %v335_v41 = vadd.f32 %v319_v22, %v303_v34  ;;  %v273_v42 = vmax.f32 %v168_v35, 0.0  ;;  %v259_v43 = vadd.f32 %v258_v36, %v689_v29 }
  0xed   :  { %v334_v44 = vadd.f32 %v319_v22, %v302_v28  ;;  %v336_v46 = vadd.f32 %v319_v22, %v304_v37  ;;  %v275_v47 = vmax.f32 %v257_v38, 0.0  ;;  %v274_v48 = vmax.f32 %v170_v39, 0.0 }
  0xee   :  { %v345_v50 = vmul.f32 %v335_v41, %v333_v40  ;;  %v305_v51 = vmul.f32 %v291_v21, %v273_v42  ;;  %v276_v52 = vmax.f32 %v259_v43, 0.0  ;;  %v344_v55 = vmul.f32 %v332_v24, %v330_v23  ;;  %v451_v24 = vpop.permute.xlu1 %450 }
  0xef   :  { %v307_v54 = vmul.f32 %v291_v21, %v275_v47  ;;  %v306_v45 = vmul.f32 %v291_v21, %v274_v48  ;;  %v341_v56 = vmul.f32 %v327_v62, %v325_v61  ;;  %v346_v59 = vmul.f32 %v336_v46, %v334_v44  ;;  %v349_v61 = vld [vmem:[%s713_s3] sm:$0xff]  ;;  %v352_v62 = vpop.permute.xlu0 %351  ;;  %s590_s3 = smov [#allocation2]  }
  0xf0   :  { %v308_v57 = vmul.f32 %v291_v21, %v276_v52  ;;  %v337_v58 = vadd.f32 %v323_v49, %v305_v51  ;;  %v527_v0 = vpack.c.bf16 %v344_v55, %v342_v53  ;;  %v589_v30 = vmov 1966171168   ;;  %s494_s23 = sshll.u32 %s590_s3, 4  ;;  %s495_s23 = int_to_ptr.vmem [resolvable:$true] %s494_s23 }
  0xf1   :  { %v338_v60 = vadd.f32 %v323_v49, %v306_v45  ;;  %v339_v63 = vadd.f32 %v323_v49, %v307_v54  ;;  %v529_v29 = vpack.c.bf16 %v343_v32, %v341_v56  ;;  %v469_v32 = vunpack.c.l.s4 %v589_v30  ;;  %s557_s24 = scalar_lea.vmem %s495_s23, 32  ;;  %p562_p1 = scmp.lt.s32.totalorder %s495_s23, %s495_s23 }
  0xf2   :  { %v340_v3 = vadd.f32 %v323_v49, %v308_v57  ;;  %528 = vmatprep.subr.bf16.mxu0 %v527_v0  ;;  %v471_v33 = vlaneseq  ;;  %v457_v35 = vrot.slane %v451_v24, 1  ;;  %v461_v40 = vrot.slane %v451_v24, 2  ;;  %p558_p0 = scmp.ne.s32.totalorder %s495_s23, %s557_s24  ;;  %p563_p2 = scmp.lt.s32.totalorder %s557_s24, %s557_s24 }
  0xf3   :  { %v347_v4 = vmul.f32 %v339_v63, %v337_v58  ;;  %530 = vmatpush1.bf16.msra.mxu0 %v529_v29  ;;  %v470_v37 = vunpack.c.0.s8 %v469_v32 }
  0xf4   :  { %v348_v5 = vmul.f32 %v340_v3, %v338_v60  ;;  %v472_v38 = vshrl.u32 %v471_v33, 7  ;;  %vm485_vm5 = vcmp.lt.s32.totalorder %v471_v33, 256  ;;  %p564_p3 = por %p563_p2, %p562_p1 }
  0xf5   :  { %v533_v6 = vpack.c.bf16 %v347_v4, %v345_v50 }
  0xf6   :  { %v531_v7 = vpack.c.bf16 %v348_v5, %v346_v59  ;;  %v473_v44 = vsub.s32 %v470_v37, %v472_v38  ;;  %p565_p4 = pnand %p564_p3, %p558_p0 }
  0xf8   :  { %532 = vmatprep.subr.bf16.mxu0 %v531_v7 }
  0xf9   :  { %534 = vmatpush1.bf16.msra.mxu0 %v533_v6 }
  0xfc   :  { %514 = vmatmul.mubr.msk.f32.vlgmr.msra.gmra.mrb[8].mxu0 %vm354_vm4, %v349_v61 }
 0x1cf   :  { %v424_v1 = vpop.f32.mrb[8].mxu0 }
 0x1d0   :  { %v425_v2 = vadd.f32 %v424_v1, %v352_v62  ;;  %v426_v8 = vpop.f32.mrb[9].mxu0 }
 0x1d1   :  { %v427_v9 = vadd.f32 %v426_v8, %v352_v62 }
 0x1d2   :  { %v429_v11 = vmax.f32 %v425_v2, 0.0 }
 0x1d3   :  { %v430_v12 = vmax.f32 %v427_v9, 0.0 }
 0x1d4   :  { %v435_v13 = vmul.f32 %v433_v10, %v429_v11 }
 0x1d5   :  { %v436_v14 = vmul.f32 %v433_v10, %v430_v12 }
 0x1d6   :  { %v437_v15 = vrot.slane %v435_v13, 4 }
 0x1d7   :  { %v443_v16 = vrot.slane %v436_v14, 4 }
 0x1d8   :  { %v438_v17 = vadd.f32 %v437_v15, %v435_v13 }
 0x1d9   :  { %v444_v18 = vadd.f32 %v443_v16, %v436_v14 }
 0x1da   :  { %v439_v19 = vrot.slane %v438_v17, 2 }
 0x1db   :  { %v445_v20 = vrot.slane %v444_v18, 2 }
 0x1dc   :  { %v440_v21 = vadd.f32 %v439_v19, %v438_v17 }
 0x1dd   :  { %v446_v22 = vadd.f32 %v445_v20, %v444_v18 }
 0x1de   :  { %v441_v23 = vrot.slane %v440_v21, 1 }
 0x1df   :  { %v447_v25 = vrot.slane %v446_v22, 1 }
 0x1e0   :  { %v442_v26 = vadd.f32 %v441_v23, %v440_v21 }
 0x1e1   :  { %v448_v27 = vadd.f32 %v447_v25, %v446_v22 }
 0x1e2   :  { %v453_v34 = vadd.f32 %v451_v24, %v442_v26 }
 0x1e3   :  { %v454_v31 = vadd.f32 %v451_v24, %v448_v27 }
 0x1e4   :  { %v455_v36 = vmax.f32 %v453_v34, 0.0 }
 0x1e5   :  { %v456_v28 = vmax.f32 %v454_v31, 0.0 }
 0x1e6   :  { %v459_v39 = vmul.f32 %v457_v35, %v455_v36 }
 0x1e7   :  { %v460_v41 = vmul.f32 %v457_v35, %v456_v28 }
 0x1e8   :  { %v463_v42 = vadd.f32 %v461_v40, %v459_v39 }
 0x1e9   :  { %v464_v43 = vadd.f32 %v461_v40, %v460_v41 }
 0x1eb   :  { %v467_v46 = vcombine.low %v463_v42, %v464_v43 }
 0x1ed   :  { %v474_v47 = vrot.slane %v467_v46, %v473_v44 }
 0x1ef   :  { %v481_v48 = vrot.slane %v474_v47, %v473_v44 }
 0x1f1   :  { %487 = vst.msk [vmem:[#allocation2] sm:$0x3] %vm485_vm5, %v481_v48 }
 0x1f2   :  { %568 = shalt.err (!%p565_p4)
}
 0x1f3   :  { %s569_s27 = scalar_lea.hbm %s715_s5, 32 }
 0x1f4   :  { %p570_p5 = scmp.ne.s32.totalorder %s715_s5, %s569_s27  ;;  %p573_p6 = scmp.lt.u32.totalorder %s569_s27, %s715_s5 }
 0x1f6   :  { %p575_p7 = pnand %p573_p6, %p570_p5 }
 0x1f8   :  { %578 = shalt.err (!%p575_p7)
}
 0x1f9   :  { %497 = dma.vmem_to_hbm [thread:$0]  %s495_s23, 32, %s715_s5, [#allocation3]  }
 0x1fa   :  { %579 = dma.done.wait [#allocation3], 32  }
 0x1fb   :  { %580 = vsyncadd [#allocation3], 4294967264 }
 0x1fc   :  { %501 = vsyncpa [#allocation3], 1 }

</bundles_post_ra>
